<compile_context>
chip_gen: v6e
topology: v6e:2x2x1
jax: 0.10.0
libtpu: 0.0.40
codegen_flags: <defaults>
</compile_context>

<pallas_src>
import math

import numpy as np

import jax
import jax.numpy as jnp
from jax.experimental import pallas as pl
from jax.experimental.pallas import tpu as pltpu


# ----------------------------------------------------------------------------
# Fused Pallas kernel: all 4 encoders, both directions, all gates, all steps.
# ----------------------------------------------------------------------------
def _fused_state_encoder_kernel(x_ref, wih_f_ref, whh_f_ref, b_f_ref,
                                wih_b_ref, b_b_ref, out_ref):
    # x_ref:     (T*B, 4E)   time-major, encoder-concatenated inputs
    # wih_f_ref: (4E, 4*Hs)  fused forward  input->gate weights (gate-major lanes)
    # whh_f_ref: (Hs, 4*Hs)  fused forward  hidden->gate weights (block-diagonal)
    # b_f_ref:   (1,  4*Hs)  fused forward  bias (b_ih + b_hh)
    # wih_b_ref: (4E, 4*Hs)  fused backward input->gate weights
    # b_b_ref:   (1,  4*Hs)  fused backward bias
    # out_ref:   (B,  2*Hs)  [ fwd hidden (Hs) | bwd hidden (Hs) ]
    B = out_ref.shape[0]
    Hs = whh_f_ref.shape[0]
    T = x_ref.shape[0] // B

    x_all = x_ref[...]                                            # (T*B, 4E)

    # Hoisted input projection for ALL time steps, bias folded in: 1 MXU matmul.
    xproj = (jnp.dot(x_all, wih_f_ref[...],
                     preferred_element_type=jnp.float32)
             + b_f_ref[...])                                      # (T*B, 4*Hs)

    whh = whh_f_ref[...]                                          # (Hs, 4*Hs)

    h = jnp.zeros((B, Hs), jnp.float32)
    c = jnp.zeros((B, Hs), jnp.float32)
    # T is small and static -> fully unrolled recurrence, (h, c) live in vregs.
    for t in range(T):
        z = xproj[t * B:(t + 1) * B, :] + jnp.dot(
            h, whh, preferred_element_type=jnp.float32)           # (B, 4*Hs)
        i_g = jax.nn.sigmoid(z[:, 0 * Hs:1 * Hs])
        f_g = jax.nn.sigmoid(z[:, 1 * Hs:2 * Hs])
        g_g = jnp.tanh(z[:, 2 * Hs:3 * Hs])
        o_g = jax.nn.sigmoid(z[:, 3 * Hs:4 * Hs])
        c = f_g * c + i_g * g_g
        h = o_g * jnp.tanh(c)

    # Backward direction = ONE LSTM step from zero state on x[:, T-1, :]
    # (that is all pad_packed_sequence(out)[-1] sees of the reverse pass).
    x_last = x_all[(T - 1) * B:T * B, :]                          # (B, 4E)
    zb = (jnp.dot(x_last, wih_b_ref[...],
                  preferred_element_type=jnp.float32)
          + b_b_ref[...])                                         # (B, 4*Hs)
    i_b = jax.nn.sigmoid(zb[:, 0 * Hs:1 * Hs])
    g_b = jnp.tanh(zb[:, 2 * Hs:3 * Hs])
    o_b = jax.nn.sigmoid(zb[:, 3 * Hs:4 * Hs])
    h_b = o_b * jnp.tanh(i_b * g_b)          # c_prev = 0 -> forget gate unused

    out_ref[...] = jnp.concatenate([h, h_b], axis=-1)             # (B, 2*Hs)


# ----------------------------------------------------------------------------
# Wrapper: one pallas_call for the whole StateEncoder.
# ----------------------------------------------------------------------------
def state_encoder_forward(token_embeddings, fused_params, hidden_sizes):
    """token_embeddings: list of 4 arrays (B, T, E) (equal T). Returns (B, 2*sum(H))."""
    wih_f, whh_f, b_f, wih_b, b_b = fused_params
    B, T, E = token_embeddings[0].shape
    n_enc = len(token_embeddings)
    Hs = sum(hidden_sizes)

    # Concatenate encoder inputs on the feature axis, go time-major, flatten to
    # 2D so the kernel needs no in-kernel reshapes.
    x_cat = jnp.concatenate(token_embeddings, axis=-1)            # (B, T, 4E)
    x2d = jnp.transpose(x_cat, (1, 0, 2)).reshape(T * B, n_enc * E)

    vmem = pl.BlockSpec(memory_space=pltpu.MemorySpace.VMEM)
    out = pl.pallas_call(
        _fused_state_encoder_kernel,
        out_shape=jax.ShapeDtypeStruct((B, 2 * Hs), jnp.float32),
        in_specs=[vmem] * 6,
        out_specs=vmem,
    )(x2d, wih_f, whh_f, b_f, wih_b, b_b)

    # Kernel output is [fwd_0|fwd_1|fwd_2|fwd_3 | bwd_0|bwd_1|bwd_2|bwd_3];
    # PyTorch concatenates per-encoder [fwd_i | bwd_i] blocks.
    pieces, off = [], 0
    for h in hidden_sizes:
        pieces.append(out[:, off:off + h])
        pieces.append(out[:, Hs + off:Hs + off + h])
        off += h
    return jnp.concatenate(pieces, axis=1)                        # (B, 2*hidden)


# ----------------------------------------------------------------------------
# Deterministic parameter init (PyTorch LSTM default U(-1/sqrt(H), 1/sqrt(H)))
# and packing into fused lane-dense matrices.
# ----------------------------------------------------------------------------
def init_lstm_direction(key, embedding_size, hidden_size):
    E, H = embedding_size, hidden_size
    bound = 1.0 / math.sqrt(H)
    k1, k2, k3, k4 = jax.random.split(key, 4)
    w_ih = jax.random.uniform(k1, (4 * H, E), jnp.float32, -bound, bound)
    w_hh = jax.random.uniform(k2, (4 * H, H), jnp.float32, -bound, bound)
    b_ih = jax.random.uniform(k3, (4 * H,), jnp.float32, -bound, bound)
    b_hh = jax.random.uniform(k4, (4 * H,), jnp.float32, -bound, bound)
    return {"w_ih": w_ih, "w_hh": w_hh, "b": b_ih + b_hh}


def init_state_encoder_params(key, embedding_size, hidden_size):
    hidden_sizes = [hidden_size // 2, hidden_size // 4,
                    hidden_size // 8, hidden_size // 8]
    keys = jax.random.split(key, 2 * len(hidden_sizes))
    params = []
    for i, h in enumerate(hidden_sizes):
        fwd = init_lstm_direction(keys[2 * i], embedding_size, h)
        bwd = init_lstm_direction(keys[2 * i + 1], embedding_size, h)
        params.append((fwd, bwd))
    return params, hidden_sizes


def pack_fused_params(params, embedding_size, hidden_sizes):
    """Pack per-encoder PyTorch-layout LSTM params into fused matrices.

    Fused hidden vector = concat of the 4 encoders' forward hiddens (Hs=sum H_i).
    Gate g of encoder i occupies fused lanes [g*Hs + off_i, g*Hs + off_i + H_i).
    The backward direction only ever runs one step from zero state, so its W_hh
    is never needed.
    """
    E = embedding_size
    n = len(hidden_sizes)
    Hs = sum(hidden_sizes)
    wih_f = np.zeros((n * E, 4 * Hs), np.float32)
    whh_f = np.zeros((Hs, 4 * Hs), np.float32)
    b_f = np.zeros((1, 4 * Hs), np.float32)
    wih_b = np.zeros((n * E, 4 * Hs), np.float32)
    b_b = np.zeros((1, 4 * Hs), np.float32)

    off = 0
    for i, H in enumerate(hidden_sizes):
        fwd, bwd = params[i]
        w_ih_fw = np.asarray(fwd["w_ih"])
        w_hh_fw = np.asarray(fwd["w_hh"])
        bias_fw = np.asarray(fwd["b"])
        w_ih_bw = np.asarray(bwd["w_ih"])
        bias_bw = np.asarray(bwd["b"])
        for g in range(4):
            col = g * Hs + off
            wih_f[i * E:(i + 1) * E, col:col + H] = w_ih_fw[g * H:(g + 1) * H, :].T
            whh_f[off:off + H, col:col + H] = w_hh_fw[g * H:(g + 1) * H, :].T
            b_f[0, col:col + H] = bias_fw[g * H:(g + 1) * H]
            wih_b[i * E:(i + 1) * E, col:col + H] = w_ih_bw[g * H:(g + 1) * H, :].T
            b_b[0, col:col + H] = bias_bw[g * H:(g + 1) * H]
        off += H

    return tuple(jnp.asarray(a) for a in (wih_f, whh_f, b_f, wih_b, b_b))


# ----------------------------------------------------------------------------
# Pure-JAX reference (mirrors the PyTorch module) for a correctness check.
# ----------------------------------------------------------------------------
def _reference_state_encoder(token_embeddings, params, hidden_sizes):
    hp = jax.lax.Precision.HIGHEST

    def lstm_step(x, h, c, p):
        z = (jnp.dot(x, p["w_ih"].T, precision=hp)
             + jnp.dot(h, p["w_hh"].T, precision=hp) + p["b"])
        H = h.shape[-1]
        i = jax.nn.sigmoid(z[:, 0 * H:1 * H])
        f = jax.nn.sigmoid(z[:, 1 * H:2 * H])
        g = jnp.tanh(z[:, 2 * H:3 * H])
        o = jax.nn.sigmoid(z[:, 3 * H:4 * H])
        c = f * c + i * g
        return o * jnp.tanh(c), c

    outs = []
    for x, (fwd, bwd), H in zip(token_embeddings, params, hidden_sizes):
        B, T, _ = x.shape
        h = jnp.zeros((B, H), jnp.float32)
        c = jnp.zeros((B, H), jnp.float32)
        for t in range(T):
            h, c = lstm_step(x[:, t, :], h, c, fwd)
        hb, _ = lstm_step(x[:, T - 1, :], jnp.zeros((B, H), jnp.float32),
                          jnp.zeros((B, H), jnp.float32), bwd)
        outs.append(jnp.concatenate([h, hb], axis=1))
    return jnp.concatenate(outs, axis=1)


if __name__ == "__main__":
    embedding_size = 16
    hidden_size = 32
    batch = 2
    seq = 8

    root = jax.random.PRNGKey(0)
    k_params, k_x = jax.random.split(root)
    params, hidden_sizes = init_state_encoder_params(k_params, embedding_size,
                                                     hidden_size)
    fused = pack_fused_params(params, embedding_size, hidden_sizes)

    xkeys = jax.random.split(k_x, 4)
    token_embeddings = [
        jax.random.normal(k, (batch, seq, embedding_size), jnp.float32)
        for k in xkeys
    ]

    out = state_encoder_forward(token_embeddings, fused, hidden_sizes)
    out = jax.block_until_ready(out)
    assert out.shape == (batch, 2 * hidden_size), out.shape
    assert bool(jnp.all(jnp.isfinite(out)))

    ref = _reference_state_encoder(token_embeddings, params, hidden_sizes)
    max_err = float(jnp.max(jnp.abs(out - ref)))
    assert max_err < 2e-2, f"kernel vs reference max abs err = {max_err}"

    print("KERNEL_OK")
</pallas_src>

<mosaic_0001>
module attributes {stable_mosaic.version = 11 : i64} {
  func.func @_fused_state_encoder_kernel(%arg0: memref<16x64xf32, #tpu.memory_space<vmem>>, %arg1: memref<64x128xf32, #tpu.memory_space<vmem>>, %arg2: memref<32x128xf32, #tpu.memory_space<vmem>>, %arg3: memref<1x128xf32, #tpu.memory_space<vmem>>, %arg4: memref<64x128xf32, #tpu.memory_space<vmem>>, %arg5: memref<1x128xf32, #tpu.memory_space<vmem>>, %arg6: memref<2x64xf32, #tpu.memory_space<vmem>>) attributes {dimension_semantics = [], scalar_prefetch = 0 : i64, scratch_operands = 0 : i64, tpu.core_type = #tpu.core_type<tc>} {
    %c0 = arith.constant 0 : index
    %c0_0 = arith.constant 0 : index
    %0 = vector.load %arg0[%c0, %c0_0] : memref<16x64xf32, #tpu.memory_space<vmem>>, vector<16x64xf32>
    %c0_1 = arith.constant 0 : index
    %c0_2 = arith.constant 0 : index
    %1 = vector.load %arg1[%c0_1, %c0_2] : memref<64x128xf32, #tpu.memory_space<vmem>>, vector<64x128xf32>
    %cst = arith.constant dense<0.000000e+00> : vector<16x128xf32>
    %2 = tpu.matmul %0, %1, %cst {dimension_numbers = #tpu.dot_dimension_numbers<[1], [0], [0], [1], [0, 0, 1, 1], [], []>} : vector<16x64xf32>, vector<64x128xf32>, vector<16x128xf32> -> vector<16x128xf32>
    %c0_3 = arith.constant 0 : index
    %c0_4 = arith.constant 0 : index
    %3 = vector.load %arg3[%c0_3, %c0_4] : memref<1x128xf32, #tpu.memory_space<vmem>>, vector<1x128xf32>
    %4 = vector.broadcast %3 : vector<1x128xf32> to vector<16x128xf32>
    %5 = arith.addf %2, %4 : vector<16x128xf32>
    %c0_5 = arith.constant 0 : index
    %c0_6 = arith.constant 0 : index
    %6 = vector.load %arg2[%c0_5, %c0_6] : memref<32x128xf32, #tpu.memory_space<vmem>>, vector<32x128xf32>
    %cst_7 = arith.constant 0.000000e+00 : f32
    %7 = vector.broadcast %cst_7 : f32 to vector<2x32xf32>
    %cst_8 = arith.constant 0.000000e+00 : f32
    %8 = vector.broadcast %cst_8 : f32 to vector<2x32xf32>
    %9 = vector.extract_strided_slice %5 {offsets = [0, 0], sizes = [2, 128], strides = [1, 1]} : vector<16x128xf32> to vector<2x128xf32>
    %cst_9 = arith.constant dense<0.000000e+00> : vector<2x128xf32>
    %10 = tpu.matmul %7, %6, %cst_9 {dimension_numbers = #tpu.dot_dimension_numbers<[1], [0], [0], [1], [0, 0, 1, 1], [], []>} : vector<2x32xf32>, vector<32x128xf32>, vector<2x128xf32> -> vector<2x128xf32>
    %11 = arith.addf %9, %10 : vector<2x128xf32>
    %12 = vector.extract_strided_slice %11 {offsets = [0, 0], sizes = [2, 32], strides = [1, 1]} : vector<2x128xf32> to vector<2x32xf32>
    %13 = arith.negf %12 : vector<2x32xf32>
    %14 = math.exp %13 : vector<2x32xf32>
    %cst_10 = arith.constant 1.000000e+00 : f32
    %15 = vector.broadcast %cst_10 : f32 to vector<2x32xf32>
    %16 = arith.addf %15, %14 : vector<2x32xf32>
    %17 = arith.divf %15, %16 : vector<2x32xf32>
    %18 = vector.extract_strided_slice %11 {offsets = [0, 32], sizes = [2, 32], strides = [1, 1]} : vector<2x128xf32> to vector<2x32xf32>
    %19 = arith.negf %18 : vector<2x32xf32>
    %20 = math.exp %19 : vector<2x32xf32>
    %cst_11 = arith.constant 1.000000e+00 : f32
    %21 = vector.broadcast %cst_11 : f32 to vector<2x32xf32>
    %22 = arith.addf %21, %20 : vector<2x32xf32>
    %23 = arith.divf %21, %22 : vector<2x32xf32>
    %24 = vector.extract_strided_slice %11 {offsets = [0, 64], sizes = [2, 32], strides = [1, 1]} : vector<2x128xf32> to vector<2x32xf32>
    %25 = math.tanh %24 : vector<2x32xf32>
    %26 = vector.extract_strided_slice %11 {offsets = [0, 96], sizes = [2, 32], strides = [1, 1]} : vector<2x128xf32> to vector<2x32xf32>
    %27 = arith.negf %26 : vector<2x32xf32>
    %28 = math.exp %27 : vector<2x32xf32>
    %cst_12 = arith.constant 1.000000e+00 : f32
    %29 = vector.broadcast %cst_12 : f32 to vector<2x32xf32>
    %30 = arith.addf %29, %28 : vector<2x32xf32>
    %31 = arith.divf %29, %30 : vector<2x32xf32>
    %32 = arith.mulf %23, %8 : vector<2x32xf32>
    %33 = arith.mulf %17, %25 : vector<2x32xf32>
    %34 = arith.addf %32, %33 : vector<2x32xf32>
    %35 = math.tanh %34 : vector<2x32xf32>
    %36 = arith.mulf %31, %35 : vector<2x32xf32>
    %37 = vector.extract_strided_slice %5 {offsets = [2, 0], sizes = [2, 128], strides = [1, 1]} : vector<16x128xf32> to vector<2x128xf32>
    %cst_13 = arith.constant dense<0.000000e+00> : vector<2x128xf32>
    %38 = tpu.matmul %36, %6, %cst_13 {dimension_numbers = #tpu.dot_dimension_numbers<[1], [0], [0], [1], [0, 0, 1, 1], [], []>} : vector<2x32xf32>, vector<32x128xf32>, vector<2x128xf32> -> vector<2x128xf32>
    %39 = arith.addf %37, %38 : vector<2x128xf32>
    %40 = vector.extract_strided_slice %39 {offsets = [0, 0], sizes = [2, 32], strides = [1, 1]} : vector<2x128xf32> to vector<2x32xf32>
    %41 = arith.negf %40 : vector<2x32xf32>
    %42 = math.exp %41 : vector<2x32xf32>
    %cst_14 = arith.constant 1.000000e+00 : f32
    %43 = vector.broadcast %cst_14 : f32 to vector<2x32xf32>
    %44 = arith.addf %43, %42 : vector<2x32xf32>
    %45 = arith.divf %43, %44 : vector<2x32xf32>
    %46 = vector.extract_strided_slice %39 {offsets = [0, 32], sizes = [2, 32], strides = [1, 1]} : vector<2x128xf32> to vector<2x32xf32>
    %47 = arith.negf %46 : vector<2x32xf32>
    %48 = math.exp %47 : vector<2x32xf32>
    %cst_15 = arith.constant 1.000000e+00 : f32
    %49 = vector.broadcast %cst_15 : f32 to vector<2x32xf32>
    %50 = arith.addf %49, %48 : vector<2x32xf32>
    %51 = arith.divf %49, %50 : vector<2x32xf32>
    %52 = vector.extract_strided_slice %39 {offsets = [0, 64], sizes = [2, 32], strides = [1, 1]} : vector<2x128xf32> to vector<2x32xf32>
    %53 = math.tanh %52 : vector<2x32xf32>
    %54 = vector.extract_strided_slice %39 {offsets = [0, 96], sizes = [2, 32], strides = [1, 1]} : vector<2x128xf32> to vector<2x32xf32>
    %55 = arith.negf %54 : vector<2x32xf32>
    %56 = math.exp %55 : vector<2x32xf32>
    %cst_16 = arith.constant 1.000000e+00 : f32
    %57 = vector.broadcast %cst_16 : f32 to vector<2x32xf32>
    %58 = arith.addf %57, %56 : vector<2x32xf32>
    %59 = arith.divf %57, %58 : vector<2x32xf32>
    %60 = arith.mulf %51, %34 : vector<2x32xf32>
    %61 = arith.mulf %45, %53 : vector<2x32xf32>
    %62 = arith.addf %60, %61 : vector<2x32xf32>
    %63 = math.tanh %62 : vector<2x32xf32>
    %64 = arith.mulf %59, %63 : vector<2x32xf32>
    %65 = vector.extract_strided_slice %5 {offsets = [4, 0], sizes = [2, 128], strides = [1, 1]} : vector<16x128xf32> to vector<2x128xf32>
    %cst_17 = arith.constant dense<0.000000e+00> : vector<2x128xf32>
    %66 = tpu.matmul %64, %6, %cst_17 {dimension_numbers = #tpu.dot_dimension_numbers<[1], [0], [0], [1], [0, 0, 1, 1], [], []>} : vector<2x32xf32>, vector<32x128xf32>, vector<2x128xf32> -> vector<2x128xf32>
    %67 = arith.addf %65, %66 : vector<2x128xf32>
    %68 = vector.extract_strided_slice %67 {offsets = [0, 0], sizes = [2, 32], strides = [1, 1]} : vector<2x128xf32> to vector<2x32xf32>
    %69 = arith.negf %68 : vector<2x32xf32>
    %70 = math.exp %69 : vector<2x32xf32>
    %cst_18 = arith.constant 1.000000e+00 : f32
    %71 = vector.broadcast %cst_18 : f32 to vector<2x32xf32>
    %72 = arith.addf %71, %70 : vector<2x32xf32>
    %73 = arith.divf %71, %72 : vector<2x32xf32>
    %74 = vector.extract_strided_slice %67 {offsets = [0, 32], sizes = [2, 32], strides = [1, 1]} : vector<2x128xf32> to vector<2x32xf32>
    %75 = arith.negf %74 : vector<2x32xf32>
    %76 = math.exp %75 : vector<2x32xf32>
    %cst_19 = arith.constant 1.000000e+00 : f32
    %77 = vector.broadcast %cst_19 : f32 to vector<2x32xf32>
    %78 = arith.addf %77, %76 : vector<2x32xf32>
    %79 = arith.divf %77, %78 : vector<2x32xf32>
    %80 = vector.extract_strided_slice %67 {offsets = [0, 64], sizes = [2, 32], strides = [1, 1]} : vector<2x128xf32> to vector<2x32xf32>
    %81 = math.tanh %80 : vector<2x32xf32>
    %82 = vector.extract_strided_slice %67 {offsets = [0, 96], sizes = [2, 32], strides = [1, 1]} : vector<2x128xf32> to vector<2x32xf32>
    %83 = arith.negf %82 : vector<2x32xf32>
    %84 = math.exp %83 : vector<2x32xf32>
    %cst_20 = arith.constant 1.000000e+00 : f32
    %85 = vector.broadcast %cst_20 : f32 to vector<2x32xf32>
    %86 = arith.addf %85, %84 : vector<2x32xf32>
    %87 = arith.divf %85, %86 : vector<2x32xf32>
    %88 = arith.mulf %79, %62 : vector<2x32xf32>
    %89 = arith.mulf %73, %81 : vector<2x32xf32>
    %90 = arith.addf %88, %89 : vector<2x32xf32>
    %91 = math.tanh %90 : vector<2x32xf32>
    %92 = arith.mulf %87, %91 : vector<2x32xf32>
    %93 = vector.extract_strided_slice %5 {offsets = [6, 0], sizes = [2, 128], strides = [1, 1]} : vector<16x128xf32> to vector<2x128xf32>
    %cst_21 = arith.constant dense<0.000000e+00> : vector<2x128xf32>
    %94 = tpu.matmul %92, %6, %cst_21 {dimension_numbers = #tpu.dot_dimension_numbers<[1], [0], [0], [1], [0, 0, 1, 1], [], []>} : vector<2x32xf32>, vector<32x128xf32>, vector<2x128xf32> -> vector<2x128xf32>
    %95 = arith.addf %93, %94 : vector<2x128xf32>
    %96 = vector.extract_strided_slice %95 {offsets = [0, 0], sizes = [2, 32], strides = [1, 1]} : vector<2x128xf32> to vector<2x32xf32>
    %97 = arith.negf %96 : vector<2x32xf32>
    %98 = math.exp %97 : vector<2x32xf32>
    %cst_22 = arith.constant 1.000000e+00 : f32
    %99 = vector.broadcast %cst_22 : f32 to vector<2x32xf32>
    %100 = arith.addf %99, %98 : vector<2x32xf32>
    %101 = arith.divf %99, %100 : vector<2x32xf32>
    %102 = vector.extract_strided_slice %95 {offsets = [0, 32], sizes = [2, 32], strides = [1, 1]} : vector<2x128xf32> to vector<2x32xf32>
    %103 = arith.negf %102 : vector<2x32xf32>
    %104 = math.exp %103 : vector<2x32xf32>
    %cst_23 = arith.constant 1.000000e+00 : f32
    %105 = vector.broadcast %cst_23 : f32 to vector<2x32xf32>
    %106 = arith.addf %105, %104 : vector<2x32xf32>
    %107 = arith.divf %105, %106 : vector<2x32xf32>
    %108 = vector.extract_strided_slice %95 {offsets = [0, 64], sizes = [2, 32], strides = [1, 1]} : vector<2x128xf32> to vector<2x32xf32>
    %109 = math.tanh %108 : vector<2x32xf32>
    %110 = vector.extract_strided_slice %95 {offsets = [0, 96], sizes = [2, 32], strides = [1, 1]} : vector<2x128xf32> to vector<2x32xf32>
    %111 = arith.negf %110 : vector<2x32xf32>
    %112 = math.exp %111 : vector<2x32xf32>
    %cst_24 = arith.constant 1.000000e+00 : f32
    %113 = vector.broadcast %cst_24 : f32 to vector<2x32xf32>
    %114 = arith.addf %113, %112 : vector<2x32xf32>
    %115 = arith.divf %113, %114 : vector<2x32xf32>
    %116 = arith.mulf %107, %90 : vector<2x32xf32>
    %117 = arith.mulf %101, %109 : vector<2x32xf32>
    %118 = arith.addf %116, %117 : vector<2x32xf32>
    %119 = math.tanh %118 : vector<2x32xf32>
    %120 = arith.mulf %115, %119 : vector<2x32xf32>
    %121 = vector.extract_strided_slice %5 {offsets = [8, 0], sizes = [2, 128], strides = [1, 1]} : vector<16x128xf32> to vector<2x128xf32>
    %cst_25 = arith.constant dense<0.000000e+00> : vector<2x128xf32>
    %122 = tpu.matmul %120, %6, %cst_25 {dimension_numbers = #tpu.dot_dimension_numbers<[1], [0], [0], [1], [0, 0, 1, 1], [], []>} : vector<2x32xf32>, vector<32x128xf32>, vector<2x128xf32> -> vector<2x128xf32>
    %123 = arith.addf %121, %122 : vector<2x128xf32>
    %124 = vector.extract_strided_slice %123 {offsets = [0, 0], sizes = [2, 32], strides = [1, 1]} : vector<2x128xf32> to vector<2x32xf32>
    %125 = arith.negf %124 : vector<2x32xf32>
    %126 = math.exp %125 : vector<2x32xf32>
    %cst_26 = arith.constant 1.000000e+00 : f32
    %127 = vector.broadcast %cst_26 : f32 to vector<2x32xf32>
    %128 = arith.addf %127, %126 : vector<2x32xf32>
    %129 = arith.divf %127, %128 : vector<2x32xf32>
    %130 = vector.extract_strided_slice %123 {offsets = [0, 32], sizes = [2, 32], strides = [1, 1]} : vector<2x128xf32> to vector<2x32xf32>
    %131 = arith.negf %130 : vector<2x32xf32>
    %132 = math.exp %131 : vector<2x32xf32>
    %cst_27 = arith.constant 1.000000e+00 : f32
    %133 = vector.broadcast %cst_27 : f32 to vector<2x32xf32>
    %134 = arith.addf %133, %132 : vector<2x32xf32>
    %135 = arith.divf %133, %134 : vector<2x32xf32>
    %136 = vector.extract_strided_slice %123 {offsets = [0, 64], sizes = [2, 32], strides = [1, 1]} : vector<2x128xf32> to vector<2x32xf32>
    %137 = math.tanh %136 : vector<2x32xf32>
    %138 = vector.extract_strided_slice %123 {offsets = [0, 96], sizes = [2, 32], strides = [1, 1]} : vector<2x128xf32> to vector<2x32xf32>
    %139 = arith.negf %138 : vector<2x32xf32>
    %140 = math.exp %139 : vector<2x32xf32>
    %cst_28 = arith.constant 1.000000e+00 : f32
    %141 = vector.broadcast %cst_28 : f32 to vector<2x32xf32>
    %142 = arith.addf %141, %140 : vector<2x32xf32>
    %143 = arith.divf %141, %142 : vector<2x32xf32>
    %144 = arith.mulf %135, %118 : vector<2x32xf32>
    %145 = arith.mulf %129, %137 : vector<2x32xf32>
    %146 = arith.addf %144, %145 : vector<2x32xf32>
    %147 = math.tanh %146 : vector<2x32xf32>
    %148 = arith.mulf %143, %147 : vector<2x32xf32>
    %149 = vector.extract_strided_slice %5 {offsets = [10, 0], sizes = [2, 128], strides = [1, 1]} : vector<16x128xf32> to vector<2x128xf32>
    %cst_29 = arith.constant dense<0.000000e+00> : vector<2x128xf32>
    %150 = tpu.matmul %148, %6, %cst_29 {dimension_numbers = #tpu.dot_dimension_numbers<[1], [0], [0], [1], [0, 0, 1, 1], [], []>} : vector<2x32xf32>, vector<32x128xf32>, vector<2x128xf32> -> vector<2x128xf32>
    %151 = arith.addf %149, %150 : vector<2x128xf32>
    %152 = vector.extract_strided_slice %151 {offsets = [0, 0], sizes = [2, 32], strides = [1, 1]} : vector<2x128xf32> to vector<2x32xf32>
    %153 = arith.negf %152 : vector<2x32xf32>
    %154 = math.exp %153 : vector<2x32xf32>
    %cst_30 = arith.constant 1.000000e+00 : f32
    %155 = vector.broadcast %cst_30 : f32 to vector<2x32xf32>
    %156 = arith.addf %155, %154 : vector<2x32xf32>
    %157 = arith.divf %155, %156 : vector<2x32xf32>
    %158 = vector.extract_strided_slice %151 {offsets = [0, 32], sizes = [2, 32], strides = [1, 1]} : vector<2x128xf32> to vector<2x32xf32>
    %159 = arith.negf %158 : vector<2x32xf32>
    %160 = math.exp %159 : vector<2x32xf32>
    %cst_31 = arith.constant 1.000000e+00 : f32
    %161 = vector.broadcast %cst_31 : f32 to vector<2x32xf32>
    %162 = arith.addf %161, %160 : vector<2x32xf32>
    %163 = arith.divf %161, %162 : vector<2x32xf32>
    %164 = vector.extract_strided_slice %151 {offsets = [0, 64], sizes = [2, 32], strides = [1, 1]} : vector<2x128xf32> to vector<2x32xf32>
    %165 = math.tanh %164 : vector<2x32xf32>
    %166 = vector.extract_strided_slice %151 {offsets = [0, 96], sizes = [2, 32], strides = [1, 1]} : vector<2x128xf32> to vector<2x32xf32>
    %167 = arith.negf %166 : vector<2x32xf32>
    %168 = math.exp %167 : vector<2x32xf32>
    %cst_32 = arith.constant 1.000000e+00 : f32
    %169 = vector.broadcast %cst_32 : f32 to vector<2x32xf32>
    %170 = arith.addf %169, %168 : vector<2x32xf32>
    %171 = arith.divf %169, %170 : vector<2x32xf32>
    %172 = arith.mulf %163, %146 : vector<2x32xf32>
    %173 = arith.mulf %157, %165 : vector<2x32xf32>
    %174 = arith.addf %172, %173 : vector<2x32xf32>
    %175 = math.tanh %174 : vector<2x32xf32>
    %176 = arith.mulf %171, %175 : vector<2x32xf32>
    %177 = vector.extract_strided_slice %5 {offsets = [12, 0], sizes = [2, 128], strides = [1, 1]} : vector<16x128xf32> to vector<2x128xf32>
    %cst_33 = arith.constant dense<0.000000e+00> : vector<2x128xf32>
    %178 = tpu.matmul %176, %6, %cst_33 {dimension_numbers = #tpu.dot_dimension_numbers<[1], [0], [0], [1], [0, 0, 1, 1], [], []>} : vector<2x32xf32>, vector<32x128xf32>, vector<2x128xf32> -> vector<2x128xf32>
    %179 = arith.addf %177, %178 : vector<2x128xf32>
    %180 = vector.extract_strided_slice %179 {offsets = [0, 0], sizes = [2, 32], strides = [1, 1]} : vector<2x128xf32> to vector<2x32xf32>
    %181 = arith.negf %180 : vector<2x32xf32>
    %182 = math.exp %181 : vector<2x32xf32>
    %cst_34 = arith.constant 1.000000e+00 : f32
    %183 = vector.broadcast %cst_34 : f32 to vector<2x32xf32>
    %184 = arith.addf %183, %182 : vector<2x32xf32>
    %185 = arith.divf %183, %184 : vector<2x32xf32>
    %186 = vector.extract_strided_slice %179 {offsets = [0, 32], sizes = [2, 32], strides = [1, 1]} : vector<2x128xf32> to vector<2x32xf32>
    %187 = arith.negf %186 : vector<2x32xf32>
    %188 = math.exp %187 : vector<2x32xf32>
    %cst_35 = arith.constant 1.000000e+00 : f32
    %189 = vector.broadcast %cst_35 : f32 to vector<2x32xf32>
    %190 = arith.addf %189, %188 : vector<2x32xf32>
    %191 = arith.divf %189, %190 : vector<2x32xf32>
    %192 = vector.extract_strided_slice %179 {offsets = [0, 64], sizes = [2, 32], strides = [1, 1]} : vector<2x128xf32> to vector<2x32xf32>
    %193 = math.tanh %192 : vector<2x32xf32>
    %194 = vector.extract_strided_slice %179 {offsets = [0, 96], sizes = [2, 32], strides = [1, 1]} : vector<2x128xf32> to vector<2x32xf32>
    %195 = arith.negf %194 : vector<2x32xf32>
    %196 = math.exp %195 : vector<2x32xf32>
    %cst_36 = arith.constant 1.000000e+00 : f32
    %197 = vector.broadcast %cst_36 : f32 to vector<2x32xf32>
    %198 = arith.addf %197, %196 : vector<2x32xf32>
    %199 = arith.divf %197, %198 : vector<2x32xf32>
    %200 = arith.mulf %191, %174 : vector<2x32xf32>
    %201 = arith.mulf %185, %193 : vector<2x32xf32>
    %202 = arith.addf %200, %201 : vector<2x32xf32>
    %203 = math.tanh %202 : vector<2x32xf32>
    %204 = arith.mulf %199, %203 : vector<2x32xf32>
    %205 = vector.extract_strided_slice %5 {offsets = [14, 0], sizes = [2, 128], strides = [1, 1]} : vector<16x128xf32> to vector<2x128xf32>
    %cst_37 = arith.constant dense<0.000000e+00> : vector<2x128xf32>
    %206 = tpu.matmul %204, %6, %cst_37 {dimension_numbers = #tpu.dot_dimension_numbers<[1], [0], [0], [1], [0, 0, 1, 1], [], []>} : vector<2x32xf32>, vector<32x128xf32>, vector<2x128xf32> -> vector<2x128xf32>
    %207 = arith.addf %205, %206 : vector<2x128xf32>
    %208 = vector.extract_strided_slice %207 {offsets = [0, 0], sizes = [2, 32], strides = [1, 1]} : vector<2x128xf32> to vector<2x32xf32>
    %209 = arith.negf %208 : vector<2x32xf32>
    %210 = math.exp %209 : vector<2x32xf32>
    %cst_38 = arith.constant 1.000000e+00 : f32
    %211 = vector.broadcast %cst_38 : f32 to vector<2x32xf32>
    %212 = arith.addf %211, %210 : vector<2x32xf32>
    %213 = arith.divf %211, %212 : vector<2x32xf32>
    %214 = vector.extract_strided_slice %207 {offsets = [0, 32], sizes = [2, 32], strides = [1, 1]} : vector<2x128xf32> to vector<2x32xf32>
    %215 = arith.negf %214 : vector<2x32xf32>
    %216 = math.exp %215 : vector<2x32xf32>
    %cst_39 = arith.constant 1.000000e+00 : f32
    %217 = vector.broadcast %cst_39 : f32 to vector<2x32xf32>
    %218 = arith.addf %217, %216 : vector<2x32xf32>
    %219 = arith.divf %217, %218 : vector<2x32xf32>
    %220 = vector.extract_strided_slice %207 {offsets = [0, 64], sizes = [2, 32], strides = [1, 1]} : vector<2x128xf32> to vector<2x32xf32>
    %221 = math.tanh %220 : vector<2x32xf32>
    %222 = vector.extract_strided_slice %207 {offsets = [0, 96], sizes = [2, 32], strides = [1, 1]} : vector<2x128xf32> to vector<2x32xf32>
    %223 = arith.negf %222 : vector<2x32xf32>
    %224 = math.exp %223 : vector<2x32xf32>
    %cst_40 = arith.constant 1.000000e+00 : f32
    %225 = vector.broadcast %cst_40 : f32 to vector<2x32xf32>
    %226 = arith.addf %225, %224 : vector<2x32xf32>
    %227 = arith.divf %225, %226 : vector<2x32xf32>
    %228 = arith.mulf %219, %202 : vector<2x32xf32>
    %229 = arith.mulf %213, %221 : vector<2x32xf32>
    %230 = arith.addf %228, %229 : vector<2x32xf32>
    %231 = math.tanh %230 : vector<2x32xf32>
    %232 = arith.mulf %227, %231 : vector<2x32xf32>
    %233 = vector.extract_strided_slice %0 {offsets = [14, 0], sizes = [2, 64], strides = [1, 1]} : vector<16x64xf32> to vector<2x64xf32>
    %c0_41 = arith.constant 0 : index
    %c0_42 = arith.constant 0 : index
    %234 = vector.load %arg4[%c0_41, %c0_42] : memref<64x128xf32, #tpu.memory_space<vmem>>, vector<64x128xf32>
    %cst_43 = arith.constant dense<0.000000e+00> : vector<2x128xf32>
    %235 = tpu.matmul %233, %234, %cst_43 {dimension_numbers = #tpu.dot_dimension_numbers<[1], [0], [0], [1], [0, 0, 1, 1], [], []>} : vector<2x64xf32>, vector<64x128xf32>, vector<2x128xf32> -> vector<2x128xf32>
    %c0_44 = arith.constant 0 : index
    %c0_45 = arith.constant 0 : index
    %236 = vector.load %arg5[%c0_44, %c0_45] : memref<1x128xf32, #tpu.memory_space<vmem>>, vector<1x128xf32>
    %237 = vector.broadcast %236 : vector<1x128xf32> to vector<2x128xf32>
    %238 = arith.addf %235, %237 : vector<2x128xf32>
    %239 = vector.extract_strided_slice %238 {offsets = [0, 0], sizes = [2, 32], strides = [1, 1]} : vector<2x128xf32> to vector<2x32xf32>
    %240 = arith.negf %239 : vector<2x32xf32>
    %241 = math.exp %240 : vector<2x32xf32>
    %cst_46 = arith.constant 1.000000e+00 : f32
    %242 = vector.broadcast %cst_46 : f32 to vector<2x32xf32>
    %243 = arith.addf %242, %241 : vector<2x32xf32>
    %244 = arith.divf %242, %243 : vector<2x32xf32>
    %245 = vector.extract_strided_slice %238 {offsets = [0, 64], sizes = [2, 32], strides = [1, 1]} : vector<2x128xf32> to vector<2x32xf32>
    %246 = math.tanh %245 : vector<2x32xf32>
    %247 = vector.extract_strided_slice %238 {offsets = [0, 96], sizes = [2, 32], strides = [1, 1]} : vector<2x128xf32> to vector<2x32xf32>
    %248 = arith.negf %247 : vector<2x32xf32>
    %249 = math.exp %248 : vector<2x32xf32>
    %cst_47 = arith.constant 1.000000e+00 : f32
    %250 = vector.broadcast %cst_47 : f32 to vector<2x32xf32>
    %251 = arith.addf %250, %249 : vector<2x32xf32>
    %252 = arith.divf %250, %251 : vector<2x32xf32>
    %253 = arith.mulf %244, %246 : vector<2x32xf32>
    %254 = math.tanh %253 : vector<2x32xf32>
    %255 = arith.mulf %252, %254 : vector<2x32xf32>
    %256 = tpu.concatenate %232, %255 in 1 : vector<2x32xf32>, vector<2x32xf32> -> vector<2x64xf32>
    %c0_48 = arith.constant 0 : index
    %c0_49 = arith.constant 0 : index
    %257 = vector.load %arg6[%c0_48, %c0_49] : memref<2x64xf32, #tpu.memory_space<vmem>>, vector<2x64xf32>
    tpu.vector_store %arg6[%c0_48, %c0_49], %256 {strides = array<i32>} : memref<2x64xf32, #tpu.memory_space<vmem>>, vector<2x64xf32>,
    return
  }
}

</mosaic_0001>

<bundles_post_ra>
// kernel: tpu_custom_call.1
= control target key start
LH: loop header
LB: loop body
LE: loop exit
PB: predicated region body
PF: predicated region fallthrough
CT: control target
= control target key end

     0   :  { %11 = vsyncpa [#allocation3], 0  ;;  %s1798_s0 = inlined_call_operand.hbm [shape: f32[16,64], index: 0, kind: input, shape index: {}]   ;;  %s1799_s1 = inlined_call_operand.hbm [shape: f32[64,128], index: 1, kind: input, shape index: {}]   ;;  %s1800_s2 = inlined_call_operand.hbm [shape: f32[32,128], index: 2, kind: input, shape index: {}]   ;;  %s1801_s3 = inlined_call_operand.vmem [shape: f32[1,128], index: 3, kind: input, shape index: {}]   ;;  %s1802_s4 = inlined_call_operand.hbm [shape: f32[64,128], index: 4, kind: input, shape index: {}]   ;;  %s1803_s5 = inlined_call_operand.vmem [shape: f32[1,128], index: 5, kind: input, shape index: {}]   ;;  %s1804_s6 = inlined_call_operand.hbm [shape: f32[2,64], index: 6, kind: output, shape index: {}]  }
   0x1   :  { %12 = vsyncpa [#allocation6], 0 }
   0x2   :  { %13 = vsyncpa [#allocation9], 0 }
   0x3   :  { %14 = vsyncpa [#allocation4], 0  ;;  %s1558_s21 = smov [#allocation5]   ;;  %s1559_s23 = smov [#allocation2]  }
   0x4   :  { %s32_s22 = sshll.u32 %s1558_s21, 4  ;;  %s20_s24 = sshll.u32 %s1559_s23, 4  ;;  %s33_s22 = int_to_ptr.vmem [resolvable:$true] %s32_s22  ;;  %s21_s24 = int_to_ptr.vmem [resolvable:$true] %s20_s24 }
   0x5   :  { %s1458_s25 = scalar_lea.vmem %s33_s22, 1024  ;;  %p1463_p1 = scmp.lt.s32.totalorder %s33_s22, %s33_s22 }
   0x6   :  { %p1459_p0 = scmp.ne.s32.totalorder %s33_s22, %s1458_s25  ;;  %p1464_p2 = scmp.lt.s32.totalorder %s1458_s25, %s1458_s25 }
   0x8   :  { %p1465_p3 = por %p1464_p2, %p1463_p1 }
   0xa   :  { %p1466_p4 = pnand %p1465_p3, %p1459_p0 }
   0xc   :  { %1469 = shalt.err (!%p1466_p4)
}
   0xd   :  { %s1560_s26 = smov 128   ;;  %s1561_s27 = smov 8  }
   0xe   :  { %38 = dma.hbm_to_vmem [thread:$0]  %s1799_s1, 1024, %s33_s22, [#allocation6], %s1560_s26, %s1560_s26, %s1561_s27  }
   0xf   :  { %s1478_s30 = scalar_lea.vmem %s21_s24, 256  ;;  %p1483_p6 = scmp.lt.s32.totalorder %s21_s24, %s21_s24 }
  0x10   :  { %p1479_p5 = scmp.ne.s32.totalorder %s21_s24, %s1478_s30  ;;  %p1484_p7 = scmp.lt.s32.totalorder %s1478_s30, %s1478_s30 }
  0x12   :  { %p1485_p8 = por %p1484_p7, %p1483_p6 }
  0x14   :  { %p1486_p9 = pnand %p1485_p8, %p1479_p5 }
  0x16   :  { %1489 = shalt.err (!%p1486_p9)
}
  0x17   :  { %26 = dma.hbm_to_vmem [thread:$0]  %s1798_s0, 256, %s21_s24, [#allocation3], %s1560_s26, %s1560_s26, %s1561_s27  }
  0x18   :  { %s1562_s9 = smov [#allocation7]   ;;  %s1563_s11 = smov [#allocation8]  }
  0x19   :  { %s44_s10 = sshll.u32 %s1562_s9, 4  ;;  %s58_s12 = sshll.u32 %s1563_s11, 4  ;;  %s45_s10 = int_to_ptr.vmem [resolvable:$true] %s44_s10  ;;  %s59_s12 = int_to_ptr.vmem [resolvable:$true] %s58_s12 }
  0x1a   :  { %s1498_s1 = scalar_lea.vmem %s45_s10, 512  ;;  %p1503_p11 = scmp.lt.s32.totalorder %s45_s10, %s45_s10 }
  0x1b   :  { %p1499_p10 = scmp.ne.s32.totalorder %s45_s10, %s1498_s1  ;;  %p1504_p12 = scmp.lt.s32.totalorder %s1498_s1, %s1498_s1 }
  0x1d   :  { %p1505_p13 = por %p1504_p12, %p1503_p11 }
  0x1f   :  { %p1506_p0 = pnand %p1505_p13, %p1499_p10 }
  0x21   :  { %1509 = shalt.err (!%p1506_p0)
}
  0x22   :  { %50 = dma.hbm_to_vmem [thread:$0]  %s1800_s2, 512, %s45_s10, [#allocation6], %s1560_s26, %s1560_s26, %s1561_s27  }
  0x23   :  { %s1518_s0 = scalar_lea.vmem %s59_s12, 1024  ;;  %p1523_p2 = scmp.lt.s32.totalorder %s59_s12, %s59_s12 }
  0x24   :  { %p1519_p1 = scmp.ne.s32.totalorder %s59_s12, %s1518_s0  ;;  %p1524_p3 = scmp.lt.s32.totalorder %s1518_s0, %s1518_s0 }
  0x26   :  { %p1525_p4 = por %p1524_p3, %p1523_p2 }
  0x28   :  { %p1526_p5 = pnand %p1525_p4, %p1519_p1 }
  0x2a   :  { %1529 = shalt.err (!%p1526_p5)
}
  0x2b   :  { %64 = dma.hbm_to_vmem [thread:$0]  %s1802_s4, 1024, %s59_s12, [#allocation9], %s1560_s26, %s1560_s26, %s1561_s27  }
  0x2c   :  { %1550 = dma.done.wait [#allocation3], 256  }
  0x2d   :  { %1551 = vsyncadd [#allocation3], 4294967040 }
  0x2e   :  { %1552 = dma.done.wait [#allocation6], 1536  }
  0x2f   :  { %1553 = vsyncadd [#allocation6], 4294965760 }
  0x30   :  { %1554 = dma.done.wait [#allocation9], 1024  }
  0x31   :  { %1555 = vsyncadd [#allocation9], 4294966272  ;;  %v1564_v0 = vmov 0.0   ;;  %vm1565_vm0 = vmmov 0   ;;  %v88_v1 = vld [vmem:[#allocation5 + $0x38] sm:$0xff]  ;;  %v87_v2 = vld [vmem:[#allocation5 + $0x30] sm:$0xff] }
  0x32   :  { %1259 = vmatprep.subr.mxu1 %v1564_v0  ;;  %1267 = vmatprep.mubr.msk.f32.mxu1 %vm1565_vm0, %v1564_v0  ;;  %v86_v3 = vld [vmem:[#allocation5 + $0x28] sm:$0xff]  ;;  %v1632_v4 = vld [vmem:[#allocation7 + $0x18] sm:$0xff]  ;;  %v1634_v5 = vld [vmem:[#allocation7 + $0x10] sm:$0xff]  ;;  %vm96_vm1 = vcmask 523264   ;;  %s1566_s17 = smov 64   ;;  %vm182_vm2 = vcmask 261120  }
  0x33   :  { %1240 = vmatprep.subr.mxu0 %v88_v1  ;;  %1260 = vmatpush3.msra.mxu1 %v1632_v4  ;;  %v85_v6 = vld [vmem:[#allocation5 + $0x20] sm:$0xff]  ;;  %v79_v7 = vld [vmem:[#allocation2] sm:$0xff]  ;;  %v1639_v8 = vld [vmem:[#allocation7 + $0x8] sm:$0xff]  ;;  %s1569_s20 = smov [#allocation10]   ;;  %vm1141_vm3 = vcmask 523270  }
  0x34   :  { %1241 = vmatpush3.msra.mxu0 %v88_v1  ;;  %1261 = vmatprep.subr.mxu1 %v1564_v0  ;;  %v84_v9 = vld [vmem:[#allocation5 + $0x18] sm:$0xff]  ;;  %v1643_v10 = vld [vmem:[#allocation7] sm:$0xff]  ;;  %v83_v11 = vld [vmem:[#allocation5 + $0x10] sm:$0xff]  ;;  %s1149_s21 = sshll.u32 %s1569_s20, 4  ;;  %s1150_s21 = int_to_ptr.vmem [resolvable:$true] %s1149_s21 }
  0x35   :  { %1242 = vmatprep.subr.mxu0 %v87_v2  ;;  %1262 = vmatpush3.msra.mxu1 %v1634_v5  ;;  %v82_v12 = vld [vmem:[#allocation5 + $0x8] sm:$0xff]  ;;  %v81_v13 = vld [vmem:[#allocation5] sm:$0xff]  ;;  %v1651_v14 = vld [vmem:[#allocation2 + $0x8] sm:$0xff]  ;;  %s1530_s22 = scalar_lea.vmem %s1150_s21, 32  ;;  %p1535_p7 = scmp.lt.s32.totalorder %s1150_s21, %s1150_s21 }
  0x36   :  { %1243 = vmatpush3.msra.mxu0 %v87_v2  ;;  %1263 = vmatprep.subr.mxu1 %v1564_v0  ;;  %v1160_v17 = vld [vmem:[%s1801_s3] ss:$0 sm:$0xff]  ;;  %s1567_s3 = smov 32   ;;  %p1531_p6 = scmp.ne.s32.totalorder %s1150_s21, %s1530_s22 }
  0x37   :  { %1244 = vmatprep.subr.mxu0 %v86_v3  ;;  %1256 = vmatprep.mubr.msk.f32.mxu0 %vm96_vm1, %v79_v7  ;;  %p1536_p8 = scmp.lt.s32.totalorder %s1530_s22, %s1530_s22 }
  0x38   :  { %1245 = vmatpush3.msra.mxu0 %v86_v3  ;;  %1264 = vmatpush3.msra.mxu1 %v1639_v8 }
  0x39   :  { %1246 = vmatprep.subr.mxu0 %v85_v6  ;;  %1265 = vmatprep.subr.mxu1 %v1564_v0  ;;  %p1537_p9 = por %p1536_p8, %p1535_p7 }
  0x3a   :  { %1247 = vmatpush3.msra.mxu0 %v85_v6  ;;  %1266 = vmatpush3.msra.mxu1 %v1643_v10 }
  0x3b   :  { %1248 = vmatprep.subr.mxu0 %v84_v9  ;;  %1268 = vmatmul.mubr.f32.vlgmr.msra.gmra.mxu1 %v1564_v0  ;;  %p1538_p10 = pnand %p1537_p9, %p1531_p6 }
  0x3c   :  { %1249 = vmatpush3.msra.mxu0 %v84_v9  ;;  %1270 = vmatprep.subr.mxu1 %v1564_v0 }
  0x3d   :  { %1250 = vmatprep.subr.mxu0 %v83_v11  ;;  %1271 = vmatpush3.msra.mxu1 %v1632_v4 }
  0x3e   :  { %1251 = vmatpush3.msra.mxu0 %v83_v11  ;;  %1272 = vmatprep.subr.mxu1 %v1564_v0 }
  0x3f   :  { %1252 = vmatprep.subr.mxu0 %v82_v12  ;;  %1273 = vmatpush3.msra.mxu1 %v1634_v5 }
  0x40   :  { %1253 = vmatpush3.msra.mxu0 %v82_v12  ;;  %1274 = vmatprep.subr.mxu1 %v1564_v0 }
  0x41   :  { %1254 = vmatprep.subr.mxu0 %v81_v13  ;;  %1275 = vmatpush3.msra.mxu1 %v1639_v8 }
  0x42   :  { %1255 = vmatpush3.msra.mxu0 %v81_v13  ;;  %1276 = vmatprep.subr.mxu1 %v1564_v0 }
  0x43   :  { %1257 = vmatmul.mubr.msk.f32.vlgmr.msra.gmra.mxu0 %vm96_vm1, %v1651_v14  ;;  %1278 = vmatprep.mubr.msk.f32.mxu1 %vm1565_vm0, %v1564_v0 }
  0x44   :  { %1277 = vmatpush3.msra.mxu1 %v1643_v10  ;;  %1303 = vmatprep.subr.mxu0 %v1564_v0 }
  0x45   :  { %1281 = vmatprep.subr.mxu1 %v1564_v0  ;;  %1304 = vmatpush3.msra.mxu0 %v1632_v4 }
  0x46   :  { %1305 = vmatprep.subr.mxu0 %v1564_v0  ;;  %1311 = vmatprep.mubr.msk.f32.mxu0 %vm1565_vm0, %v1564_v0 }
  0x47   :  { %1306 = vmatpush3.msra.mxu0 %v1634_v5 }
  0x48   :  { %1307 = vmatprep.subr.mxu0 %v1564_v0 }
  0x49   :  { %1308 = vmatpush3.msra.mxu0 %v1639_v8 }
  0x4a   :  { %1309 = vmatprep.subr.mxu0 %v1564_v0 }
  0x4b   :  { %1310 = vmatpush3.msra.mxu0 %v1643_v10 }
  0x4c   :  { %1325 = vmatprep.subr.mxu0 %v1564_v0 }
  0xfb   :  { %v252_v15 = vpop.f32.mrf.mxu1 }
  0xfd   :  { %v1269_v16 = vpop.f32.mrf.mxu1 }
 0x103   :  { %v1258_v18 = vpop.f32.mrf.mxu0 }
 0x104   :  { %v1678_v19 = vadd.f32 %v1258_v18, %v1160_v17 }
 0x105   :  { %v169_v20 = vpop.f32.mrf.mxu0 }
 0x106   :  { %v1680_v21 = vadd.f32 %v1160_v17, %v169_v20 }
 0x108   :  { %v256_v22 = vadd.f32 %v252_v15, %v1680_v21 }
 0x10a   :  { %1378 = vtanh.f32 %v256_v22  ;;  %v1163_v24 = vmul.f32 -1.442695, %v256_v22 }
 0x10c   :  { %1380 = vpow2.f32 %v1163_v24 }
 0x117   :  { %v1379_v23 = vpop.eup %1378 }
 0x118   :  { %266 = vrot.lane.b32.xlu0 %v1379_v23, %s1566_s17 }
 0x119   :  { %v1381_v25 = vpop.eup %1380 }
 0x11a   :  { %v260_v26 = vadd.f32 1.0, %v1381_v25 }
 0x11c   :  { %1382 = vrcp.f32 %v260_v26 }
 0x129   :  { %v1383_v27 = vpop.eup %1382 }
 0x12a   :  { %v264_v30 = vmul.f32 0.0, %v1383_v27 }
 0x18a   :  { %v267_v28 = vpop.permute.xlu0 %266 }
 0x18b   :  { %v269_v29 = vmul.f32 %v1383_v27, %v267_v28 }
 0x18d   :  { %271 = vrot.lane.b32.xlu0 %v269_v29, %s1567_s3 }
 0x1ff   :  { %v272_v31 = vpop.permute.xlu0 %271 }
 0x200   :  { %v274_v32 = vadd.f32 %v272_v31, %v264_v30 }
 0x202   :  { %1384 = vtanh.f32 %v274_v32  ;;  %v368_v48 = vrot.slane %v274_v32, 6 }
 0x20f   :  { %v1385_v33 = vpop.eup %1384 }
 0x210   :  { %277 = vrot.lane.b32.xlu1 %v1385_v33, %s1566_s17 }
 0x282   :  { %v278_v34 = vpop.permute.xlu1 %277 }
 0x283   :  { %v280_v35 = vmul.f32 %v1383_v27, %v278_v34 }
 0x285   :  { %282 = vrot.lane.b32.xlu1 %v280_v35, %s1567_s3 }
 0x2f7   :  { %v283_v36 = vpop.permute.xlu1 %282 }
 0x2f8   :  { %1279 = vmatmul.mubr.msk.f32.vlgmr.msra.gmra.mxu1 %vm182_vm2, %v283_v36 }
 0x2f9   :  { %1282 = vmatpush3.msra.mxu1 %v1632_v4  ;;  %1289 = vmatprep.mubr.msk.f32.mxu1 %vm1565_vm0, %v1564_v0 }
 0x2fa   :  { %1283 = vmatprep.subr.mxu1 %v1564_v0 }
 0x2fb   :  { %1284 = vmatpush3.msra.mxu1 %v1634_v5 }
 0x2fc   :  { %1285 = vmatprep.subr.mxu1 %v1564_v0 }
 0x2fd   :  { %1286 = vmatpush3.msra.mxu1 %v1639_v8 }
 0x2fe   :  { %1287 = vmatprep.subr.mxu1 %v1564_v0 }
 0x2ff   :  { %1288 = vmatpush3.msra.mxu1 %v1643_v10 }
 0x300   :  { %1292 = vmatprep.subr.mxu1 %v1564_v0 }
 0x3b8   :  { %v352_v37 = vpop.f32.mrf.mxu1 }
 0x3b9   :  { %v357_v38 = vrot.slane %v352_v37, 6 }
 0x3ba   :  { %v1280_v39 = vpop.f32.mrf.mxu1 }
 0x3bb   :  { %v359_v40 = vadd.f32 %v357_v38, %v1680_v21 }
 0x3bd   :  { %1386 = vtanh.f32 %v359_v40  ;;  %v1165_v42 = vmul.f32 -1.442695, %v359_v40 }
 0x3bf   :  { %1388 = vpow2.f32 %v1165_v42 }
 0x3ca   :  { %v1387_v41 = vpop.eup %1386 }
 0x3cb   :  { %372 = vrot.lane.b32.xlu0 %v1387_v41, %s1566_s17 }
 0x3cc   :  { %v1389_v43 = vpop.eup %1388 }
 0x3cd   :  { %v363_v44 = vadd.f32 1.0, %v1389_v43 }
 0x3cf   :  { %1390 = vrcp.f32 %v363_v44 }
 0x3dc   :  { %v1391_v45 = vpop.eup %1390 }
 0x3dd   :  { %v370_v49 = vmul.f32 %v1391_v45, %v368_v48 }
 0x43d   :  { %v373_v46 = vpop.permute.xlu0 %372 }
 0x43e   :  { %v375_v47 = vmul.f32 %v1391_v45, %v373_v46 }
 0x440   :  { %377 = vrot.lane.b32.xlu1 %v375_v47, %s1567_s3 }
 0x4b2   :  { %v378_v50 = vpop.permute.xlu1 %377 }
 0x4b3   :  { %v380_v51 = vadd.f32 %v378_v50, %v370_v49 }
 0x4b5   :  { %1392 = vtanh.f32 %v380_v51  ;;  %v475_v7 = vrot.slane %v380_v51, 6 }
 0x4c2   :  { %v1393_v52 = vpop.eup %1392 }
 0x4c3   :  { %383 = vrot.lane.b32.xlu0 %v1393_v52, %s1566_s17 }
 0x535   :  { %v384_v53 = vpop.permute.xlu0 %383 }
 0x536   :  { %v386_v54 = vmul.f32 %v1391_v45, %v384_v53 }
 0x538   :  { %v388_v55 = vrot.slane %v386_v54, 2 }
 0x53a   :  { %389 = vrot.lane.b32.xlu1 %v388_v55, %s1567_s3 }
 0x5ac   :  { %v390_v56 = vpop.permute.xlu1 %389 }
 0x5ad   :  { %1290 = vmatmul.mubr.msk.f32.vlgmr.msra.gmra.mxu1 %vm182_vm2, %v390_v56 }
 0x5ae   :  { %1293 = vmatpush3.msra.mxu1 %v1632_v4  ;;  %1300 = vmatprep.mubr.msk.f32.mxu1 %vm1565_vm0, %v1564_v0 }
 0x5af   :  { %1294 = vmatprep.subr.mxu1 %v1564_v0 }
 0x5b0   :  { %1295 = vmatpush3.msra.mxu1 %v1634_v5 }
 0x5b1   :  { %1296 = vmatprep.subr.mxu1 %v1564_v0 }
 0x5b2   :  { %1297 = vmatpush3.msra.mxu1 %v1639_v8 }
 0x5b3   :  { %1298 = vmatprep.subr.mxu1 %v1564_v0 }
 0x5b4   :  { %1299 = vmatpush3.msra.mxu1 %v1643_v10 }
 0x5b5   :  { %1314 = vmatprep.subr.mxu1 %v1564_v0 }
 0x66d   :  { %v459_v57 = vpop.f32.mrf.mxu1 }
 0x66e   :  { %v464_v58 = vrot.slane %v459_v57, 4 }
 0x66f   :  { %v1291_v59 = vpop.f32.mrf.mxu1 }
 0x670   :  { %v466_v60 = vadd.f32 %v464_v58, %v1680_v21 }
 0x672   :  { %1394 = vtanh.f32 %v466_v60  ;;  %v1167_v62 = vmul.f32 -1.442695, %v466_v60 }
 0x674   :  { %1396 = vpow2.f32 %v1167_v62 }
 0x67f   :  { %v1395_v61 = vpop.eup %1394 }
 0x680   :  { %479 = vrot.lane.b32.xlu0 %v1395_v61, %s1566_s17 }
 0x681   :  { %v1397_v63 = vpop.eup %1396 }
 0x682   :  { %v470_v1 = vadd.f32 1.0, %v1397_v63 }
 0x684   :  { %1398 = vrcp.f32 %v470_v1 }
 0x691   :  { %v1399_v2 = vpop.eup %1398 }
 0x692   :  { %v477_v9 = vmul.f32 %v1399_v2, %v475_v7 }
 0x6f2   :  { %v480_v3 = vpop.permute.xlu0 %479 }
 0x6f3   :  { %v482_v6 = vmul.f32 %v1399_v2, %v480_v3 }
 0x6f5   :  { %484 = vrot.lane.b32.xlu1 %v482_v6, %s1567_s3 }
 0x767   :  { %v485_v11 = vpop.permute.xlu1 %484 }
 0x768   :  { %v487_v12 = vadd.f32 %v485_v11, %v477_v9 }
 0x76a   :  { %1400 = vtanh.f32 %v487_v12  ;;  %v582_v32 = vrot.slane %v487_v12, 6 }
 0x777   :  { %v1401_v13 = vpop.eup %1400 }
 0x778   :  { %490 = vrot.lane.b32.xlu0 %v1401_v13, %s1566_s17 }
 0x7ea   :  { %v491_v15 = vpop.permute.xlu0 %490 }
 0x7eb   :  { %v493_v16 = vmul.f32 %v1399_v2, %v491_v15 }
 0x7ed   :  { %v495_v17 = vrot.slane %v493_v16, 4 }
 0x7ef   :  { %496 = vrot.lane.b32.xlu1 %v495_v17, %s1567_s3 }
 0x861   :  { %v497_v18 = vpop.permute.xlu1 %496 }
 0x862   :  { %1301 = vmatmul.mubr.msk.f32.vlgmr.msra.gmra.mxu1 %vm182_vm2, %v497_v18 }
 0x863   :  { %1315 = vmatpush3.msra.mxu1 %v1632_v4  ;;  %1322 = vmatprep.mubr.msk.f32.mxu1 %vm1565_vm0, %v1564_v0 }
 0x864   :  { %1316 = vmatprep.subr.mxu1 %v1564_v0 }
 0x865   :  { %1317 = vmatpush3.msra.mxu1 %v1634_v5 }
 0x866   :  { %1318 = vmatprep.subr.mxu1 %v1564_v0 }
 0x867   :  { %1319 = vmatpush3.msra.mxu1 %v1639_v8 }
 0x868   :  { %1320 = vmatprep.subr.mxu1 %v1564_v0 }
 0x869   :  { %1321 = vmatpush3.msra.mxu1 %v1643_v10 }
 0x86a   :  { %1336 = vmatprep.subr.mxu1 %v1564_v0 }
 0x922   :  { %v566_v20 = vpop.f32.mrf.mxu1 }
 0x923   :  { %v571_v22 = vrot.slane %v566_v20, 2 }
 0x924   :  { %v1302_v23 = vpop.f32.mrf.mxu1 }
 0x925   :  { %v573_v24 = vadd.f32 %v571_v22, %v1680_v21 }
 0x927   :  { %1402 = vtanh.f32 %v573_v24  ;;  %v1169_v26 = vmul.f32 -1.442695, %v573_v24 }
 0x929   :  { %1404 = vpow2.f32 %v1169_v26 }
 0x934   :  { %v1403_v25 = vpop.eup %1402 }
 0x935   :  { %586 = vrot.lane.b32.xlu0 %v1403_v25, %s1566_s17 }
 0x936   :  { %v1405_v27 = vpop.eup %1404 }
 0x937   :  { %v577_v28 = vadd.f32 1.0, %v1405_v27 }
 0x939   :  { %1406 = vrcp.f32 %v577_v28 }
 0x946   :  { %v1407_v29 = vpop.eup %1406 }
 0x947   :  { %v584_v33 = vmul.f32 %v1407_v29, %v582_v32  ;;  %v1029_v32 = vld [vmem:[#allocation8 + $0x20] sm:$0xff] }
 0x9a7   :  { %v587_v30 = vpop.permute.xlu0 %586 }
 0x9a8   :  { %v589_v31 = vmul.f32 %v1407_v29, %v587_v30  ;;  %v1031_v30 = vld [vmem:[#allocation8 + $0x30] sm:$0xff] }
 0x9aa   :  { %591 = vrot.lane.b32.xlu1 %v589_v31, %s1567_s3  ;;  %v1030_v31 = vld [vmem:[#allocation8 + $0x28] sm:$0xff] }
 0xa1c   :  { %v592_v34 = vpop.permute.xlu1 %591 }
 0xa1d   :  { %v594_v35 = vadd.f32 %v592_v34, %v584_v33 }
 0xa1f   :  { %1408 = vtanh.f32 %v594_v35  ;;  %v686_v50 = vrot.slane %v594_v35, 6 }
 0xa2c   :  { %v1409_v21 = vpop.eup %1408 }
 0xa2d   :  { %597 = vrot.lane.b32.xlu0 %v1409_v21, %s1566_s17 }
 0xa9f   :  { %v598_v36 = vpop.permute.xlu0 %597 }
 0xaa0   :  { %v600_v37 = vmul.f32 %v1407_v29, %v598_v36  ;;  %v1032_v29 = vld [vmem:[#allocation8 + $0x38] sm:$0xff] }
 0xaa1   :  { %v1028_v36 = vld [vmem:[#allocation8 + $0x18] sm:$0xff] }
 0xaa2   :  { %v602_v38 = vrot.slane %v600_v37, 6  ;;  %v1027_v37 = vld [vmem:[#allocation8 + $0x10] sm:$0xff] }
 0xaa4   :  { %603 = vrot.lane.b32.xlu1 %v602_v38, %s1567_s3  ;;  %v1040_v38 = vrot.slane %v1651_v14, 6  ;;  %v1178_v14 = vld [vmem:[%s1803_s5] ss:$0 sm:$0xff]  ;;  %s1568_s5 = smov 96  }
 0xb16   :  { %v604_v39 = vpop.permute.xlu1 %603 }
 0xb17   :  { %1312 = vmatmul.mubr.msk.f32.vlgmr.msra.gmra.mxu0 %vm182_vm2, %v604_v39  ;;  %v1026_v39 = vld [vmem:[#allocation8 + $0x8] sm:$0xff] }
 0xb18   :  { %1326 = vmatpush3.msra.mxu0 %v1632_v4  ;;  %1333 = vmatprep.mubr.msk.f32.mxu0 %vm1565_vm0, %v1564_v0 }
 0xb19   :  { %1327 = vmatprep.subr.mxu0 %v1564_v0 }
 0xb1a   :  { %1328 = vmatpush3.msra.mxu0 %v1634_v5 }
 0xb1b   :  { %1329 = vmatprep.subr.mxu0 %v1564_v0 }
 0xb1c   :  { %1330 = vmatpush3.msra.mxu0 %v1639_v8 }
 0xb1d   :  { %1331 = vmatprep.subr.mxu0 %v1564_v0 }
 0xb1e   :  { %1332 = vmatpush3.msra.mxu0 %v1643_v10 }
 0xb1f   :  { %1347 = vmatprep.subr.mxu0 %v1564_v0 }
 0xbd7   :  { %v673_v40 = vpop.f32.mrf.mxu0 }
 0xbd8   :  { %v677_v41 = vadd.f32 %v673_v40, %v1678_v19  ;;  %v1025_v40 = vld [vmem:[#allocation8] sm:$0xff] }
 0xbd9   :  { %v1313_v42 = vpop.f32.mrf.mxu0 }
 0xbda   :  { %1410 = vtanh.f32 %v677_v41  ;;  %v1171_v44 = vmul.f32 -1.442695, %v677_v41 }
 0xbdc   :  { %1412 = vpow2.f32 %v1171_v44 }
 0xbe7   :  { %v1411_v43 = vpop.eup %1410 }
 0xbe8   :  { %690 = vrot.lane.b32.xlu0 %v1411_v43, %s1566_s17 }
 0xbe9   :  { %v1413_v45 = vpop.eup %1412 }
 0xbea   :  { %v681_v46 = vadd.f32 1.0, %v1413_v45 }
 0xbec   :  { %1414 = vrcp.f32 %v681_v46 }
 0xbf9   :  { %v1415_v47 = vpop.eup %1414 }
 0xbfa   :  { %v688_v51 = vmul.f32 %v1415_v47, %v686_v50 }
 0xc5a   :  { %v691_v48 = vpop.permute.xlu0 %690 }
 0xc5b   :  { %v693_v49 = vmul.f32 %v1415_v47, %v691_v48 }
 0xc5d   :  { %695 = vrot.lane.b32.xlu1 %v693_v49, %s1567_s3 }
 0xccf   :  { %v696_v52 = vpop.permute.xlu1 %695 }
 0xcd0   :  { %v698_v53 = vadd.f32 %v696_v52, %v688_v51 }
 0xcd2   :  { %1416 = vtanh.f32 %v698_v53 }
 0xcdf   :  { %v1417_v54 = vpop.eup %1416 }
 0xce0   :  { %701 = vrot.lane.b32.xlu0 %v1417_v54, %s1566_s17 }
 0xd52   :  { %v702_v55 = vpop.permute.xlu0 %701 }
 0xd53   :  { %v704_v56 = vmul.f32 %v1415_v47, %v702_v55 }
 0xd55   :  { %706 = vrot.lane.b32.xlu1 %v704_v56, %s1567_s3 }
 0xdc7   :  { %v707_v57 = vpop.permute.xlu1 %706 }
 0xdc8   :  { %1323 = vmatmul.mubr.msk.f32.vlgmr.msra.gmra.mxu1 %vm182_vm2, %v707_v57 }
 0xdc9   :  { %1337 = vmatpush3.msra.mxu1 %v1632_v4  ;;  %1344 = vmatprep.mubr.msk.f32.mxu1 %vm1565_vm0, %v1564_v0 }
 0xdca   :  { %1338 = vmatprep.subr.mxu1 %v1564_v0 }
 0xdcb   :  { %1339 = vmatpush3.msra.mxu1 %v1634_v5 }
 0xdcc   :  { %1340 = vmatprep.subr.mxu1 %v1564_v0 }
 0xdcd   :  { %1341 = vmatpush3.msra.mxu1 %v1639_v8 }
 0xdce   :  { %1342 = vmatprep.subr.mxu1 %v1564_v0 }
 0xdcf   :  { %1343 = vmatpush3.msra.mxu1 %v1643_v10  ;;  %v792_v10 = vrot.slane %v698_v53, 6 }
 0xe88   :  { %v776_v58 = vpop.f32.mrf.mxu1 }
 0xe89   :  { %v781_v59 = vrot.slane %v776_v58, 6 }
 0xe8a   :  { %v1324_v60 = vpop.f32.mrf.mxu1 }
 0xe8b   :  { %v783_v4 = vadd.f32 %v781_v59, %v1678_v19 }
 0xe8d   :  { %1418 = vtanh.f32 %v783_v4  ;;  %v1173_v62 = vmul.f32 -1.442695, %v783_v4 }
 0xe8f   :  { %1420 = vpow2.f32 %v1173_v62 }
 0xe9a   :  { %v1419_v61 = vpop.eup %1418 }
 0xe9b   :  { %796 = vrot.lane.b32.xlu0 %v1419_v61, %s1566_s17 }
 0xe9c   :  { %v1421_v5 = vpop.eup %1420 }
 0xe9d   :  { %v787_v63 = vadd.f32 1.0, %v1421_v5 }
 0xe9f   :  { %1422 = vrcp.f32 %v787_v63 }
 0xeac   :  { %v1423_v1 = vpop.eup %1422 }
 0xead   :  { %v794_v3 = vmul.f32 %v1423_v1, %v792_v10 }
 0xf0d   :  { %v797_v8 = vpop.permute.xlu0 %796 }
 0xf0e   :  { %v799_v2 = vmul.f32 %v1423_v1, %v797_v8 }
 0xf10   :  { %801 = vrot.lane.b32.xlu1 %v799_v2, %s1567_s3 }
 0xf82   :  { %v802_v6 = vpop.permute.xlu1 %801 }
 0xf83   :  { %v804_v7 = vadd.f32 %v802_v6, %v794_v3 }
 0xf85   :  { %1424 = vtanh.f32 %v804_v7  ;;  %v899_v33 = vrot.slane %v804_v7, 6 }
 0xf92   :  { %v1425_v9 = vpop.eup %1424 }
 0xf93   :  { %807 = vrot.lane.b32.xlu0 %v1425_v9, %s1566_s17 }
0x1005   :  { %v808_v11 = vpop.permute.xlu0 %807 }
0x1006   :  { %v810_v12 = vmul.f32 %v1423_v1, %v808_v11 }
0x1008   :  { %v812_v13 = vrot.slane %v810_v12, 2 }
0x100a   :  { %813 = vrot.lane.b32.xlu1 %v812_v13, %s1567_s3 }
0x107c   :  { %v814_v15 = vpop.permute.xlu1 %813 }
0x107d   :  { %1334 = vmatmul.mubr.msk.f32.vlgmr.msra.gmra.mxu0 %vm182_vm2, %v814_v15 }
0x107e   :  { %1363 = vmatprep.mubr.msk.f32.mxu0 %vm1565_vm0, %v1564_v0  ;;  %1348 = vmatpush3.msra.mxu0 %v1032_v29 }
0x107f   :  { %1349 = vmatprep.subr.mxu0 %v1564_v0 }
0x1080   :  { %1350 = vmatpush3.msra.mxu0 %v1031_v30 }
0x1081   :  { %1351 = vmatprep.subr.mxu0 %v1564_v0 }
0x1082   :  { %1352 = vmatpush3.msra.mxu0 %v1030_v31 }
0x1083   :  { %1353 = vmatprep.subr.mxu0 %v1564_v0 }
0x1084   :  { %1354 = vmatpush3.msra.mxu0 %v1029_v32 }
0x1085   :  { %1355 = vmatprep.subr.mxu0 %v1564_v0 }
0x1086   :  { %1356 = vmatpush3.msra.mxu0 %v1028_v36 }
0x1087   :  { %1357 = vmatprep.subr.mxu0 %v1564_v0 }
0x1088   :  { %1358 = vmatpush3.msra.mxu0 %v1027_v37 }
0x1089   :  { %1359 = vmatprep.subr.mxu0 %v1564_v0 }
0x108a   :  { %1360 = vmatpush3.msra.mxu0 %v1026_v39 }
0x108b   :  { %1361 = vmatprep.subr.mxu0 %v1564_v0 }
0x108c   :  { %1362 = vmatpush3.msra.mxu0 %v1025_v40 }
0x108d   :  { %1364 = vmatmul.mubr.msk.f32.vlgmr.msra.gmra.mxu0 %vm96_vm1, %v1040_v38 }
0x113d   :  { %v883_v16 = vpop.f32.mrf.mxu0 }
0x113e   :  { %v888_v17 = vrot.slane %v883_v16, 4 }
0x113f   :  { %v1335_v18 = vpop.f32.mrf.mxu0 }
0x1140   :  { %v890_v20 = vadd.f32 %v888_v17, %v1678_v19 }
0x1142   :  { %1426 = vtanh.f32 %v890_v20  ;;  %v1175_v23 = vmul.f32 -1.442695, %v890_v20 }
0x1144   :  { %1428 = vpow2.f32 %v1175_v23 }
0x114d   :  { %v1109_v45 = vpop.f32.mrf.mxu0 }
0x114e   :  { %v1110_v46 = vadd.f32 %v1178_v14, %v1109_v45 }
0x114f   :  { %v1427_v22 = vpop.eup %1426  ;;  %v1365_v47 = vpop.f32.mrf.mxu0 }
0x1150   :  { %903 = vrot.lane.b32.xlu0 %v1427_v22, %s1566_s17  ;;  %v1180_v49 = vmul.f32 -1.442695, %v1110_v46 }
0x1151   :  { %v1429_v24 = vpop.eup %1428 }
0x1152   :  { %v894_v25 = vadd.f32 1.0, %v1429_v24 }
0x1154   :  { %1430 = vrcp.f32 %v894_v25 }
0x1161   :  { %v1431_v26 = vpop.eup %1430 }
0x1162   :  { %v901_v34 = vmul.f32 %v1431_v26, %v899_v33 }
0x11c2   :  { %v904_v27 = vpop.permute.xlu0 %903 }
0x11c3   :  { %v906_v28 = vmul.f32 %v1431_v26, %v904_v27 }
0x11c5   :  { %908 = vrot.lane.b32.xlu1 %v906_v28, %s1567_s3 }
0x1237   :  { %v909_v35 = vpop.permute.xlu1 %908 }
0x1238   :  { %v911_v21 = vadd.f32 %v909_v35, %v901_v34 }
0x123a   :  { %1432 = vtanh.f32 %v911_v21  ;;  %v1006_v8 = vrot.slane %v911_v21, 6 }
0x123b   :  { %1434 = vtanh.f32 %v1110_v46 }
0x123c   :  { %1436 = vpow2.f32 %v1180_v49 }
0x1247   :  { %v1433_v41 = vpop.eup %1432 }
0x1248   :  { %914 = vrot.lane.b32.xlu0 %v1433_v41, %s1566_s17  ;;  %v1435_v0 = vpop.eup %1434 }
0x1249   :  { %v1437_v50 = vpop.eup %1436 }
0x124a   :  { %v1116_v51 = vadd.f32 1.0, %v1437_v50 }
0x124c   :  { %1438 = vrcp.f32 %v1116_v51 }
0x1259   :  { %v1439_v52 = vpop.eup %1438 }
0x12ba   :  { %v915_v42 = vpop.permute.xlu0 %914 }
0x12bb   :  { %v917_v43 = vmul.f32 %v1431_v26, %v915_v42 }
0x12bd   :  { %v919_v44 = vrot.slane %v917_v43, 4 }
0x12bf   :  { %920 = vrot.lane.b32.xlu1 %v919_v44, %s1567_s3 }
0x12c3   :  { %1121 = vrot.lane.b32.xlu1 %v1435_v0, %s1566_s17 }
0x1331   :  { %v921_v48 = vpop.permute.xlu1 %920 }
0x1332   :  { %1345 = vmatmul.mubr.msk.f32.vlgmr.msra.gmra.mxu1 %vm182_vm2, %v921_v48 }
0x1335   :  { %v1122_v53 = vpop.permute.xlu1 %1121 }
0x1336   :  { %v1124_v54 = vmul.f32 %v1439_v52, %v1122_v53 }
0x1338   :  { %1440 = vtanh.f32 %v1124_v54 }
0x1345   :  { %v1441_v55 = vpop.eup %1440 }
0x1346   :  { %1127 = vrot.lane.b32.xlu1 %v1441_v55, %s1568_s5 }
0x13f2   :  { %v990_v56 = vpop.f32.mrf.mxu1 }
0x13f3   :  { %v995_v57 = vrot.slane %v990_v56, 2 }
0x13f4   :  { %v1346_v58 = vpop.f32.mrf.mxu1 }
0x13f5   :  { %v997_v59 = vadd.f32 %v995_v57, %v1678_v19  ;;  %v1128_v19 = vpop.permute.xlu1 %1127 }
0x13f6   :  { %v1130_v6 = vmul.f32 %v1439_v52, %v1128_v19 }
0x13f7   :  { %1442 = vtanh.f32 %v997_v59  ;;  %v1177_v4 = vmul.f32 -1.442695, %v997_v59 }
0x13f8   :  { %v1136_v9 = vrot.slane %v1130_v6, 2 }
0x13f9   :  { %1444 = vpow2.f32 %v1177_v4 }
0x1404   :  { %v1443_v60 = vpop.eup %1442 }
0x1405   :  { %1010 = vrot.lane.b32.xlu0 %v1443_v60, %s1566_s17 }
0x1406   :  { %v1445_v61 = vpop.eup %1444 }
0x1407   :  { %v1001_v62 = vadd.f32 1.0, %v1445_v61 }
0x1409   :  { %1446 = vrcp.f32 %v1001_v62 }
0x1416   :  { %v1447_v5 = vpop.eup %1446 }
0x1417   :  { %v1008_v2 = vmul.f32 %v1447_v5, %v1006_v8 }
0x1477   :  { %v1011_v63 = vpop.permute.xlu0 %1010 }
0x1478   :  { %v1013_v1 = vmul.f32 %v1447_v5, %v1011_v63 }
0x147a   :  { %1015 = vrot.lane.b32.xlu0 %v1013_v1, %s1567_s3 }
0x14ec   :  { %v1016_v10 = vpop.permute.xlu0 %1015 }
0x14ed   :  { %v1018_v3 = vadd.f32 %v1016_v10, %v1008_v2 }
0x14ef   :  { %1448 = vtanh.f32 %v1018_v3 }
0x14fc   :  { %v1449_v7 = vpop.eup %1448 }
0x14fd   :  { %1021 = vrot.lane.b32.xlu0 %v1449_v7, %s1566_s17 }
0x1501   :  { %1137 = vrot.lane.b32.xlu0 %v1136_v9, %s1566_s17 }
0x156f   :  { %v1022_v11 = vpop.permute.xlu0 %1021 }
0x1570   :  { %v1024_v12 = vmul.f32 %v1447_v5, %v1022_v11 }
0x1572   :  { %1132 = vrot.lane.b32.xlu1 %v1024_v12, %s1567_s3 }
0x1573   :  { %v1138_v13 = vpop.permute.xlu0 %1137 }
0x15e4   :  { %v1133_v15 = vpop.permute.xlu1 %1132 }
0x15e5   :  { %v1140_v16 = vsel %vm182_vm2, %v1133_v15, %v1138_v13 }
0x15e6   :  { %1142 = vst.msk [vmem:[#allocation10 - $0x6] sm:$0xc0] %vm1141_vm3, %v1140_v16 }
0x15e7   :  { %1541 = shalt.err (!%p1538_p10)
}
0x15e8   :  { %1152 = dma.vmem_to_hbm [thread:$0]  %s1150_s21, 32, %s1804_s6, [#allocation4]  }
0x15e9   :  { %1556 = dma.done.wait [#allocation4], 32  }
0x15ea   :  { %1557 = vsyncadd [#allocation4], 4294967264 }
0x15eb   :  { %1156 = vsyncpa [#allocation3], 1 }
0x15ec   :  { %1157 = vsyncpa [#allocation6], 1 }
0x15ed   :  { %1158 = vsyncpa [#allocation9], 1 }
0x15ee   :  { %1159 = vsyncpa [#allocation4], 1 }

</bundles_post_ra>
